<compile_context>
chip_gen: v6e
topology: v6e:2x2x1
jax: 0.10.0
libtpu: 0.0.40
codegen_flags: <defaults>
</compile_context>

<pallas_src>
import jax
import jax.numpy as jnp
import numpy as np
from jax.experimental import pallas as pl
from jax.experimental.pallas import tpu as pltpu

IN_DIM = 28 * 28
HID = 64
N_CLASSES = 10
OUT_PAD = 128          # lane-dense padded logit width
DEFAULT_TILE_B = 2048  # batch rows per grid step
MAX_TILE_B = 4096      # VMEM-safe cap (f32-streamed x, all generations)


def _round_up(x, m):
    return (x + m - 1) // m * m


def _cdiv(a, b):
    return -(-a // b)


def _pick_tile(B, tile_b):
    """Pick a sublane-aligned batch tile; prefer an even tile count >= 2 for
    large batches so v7x's two TensorCores both get work."""
    tile_b = max(8, min(tile_b, MAX_TILE_B))
    B8 = _round_up(max(B, 1), 8)
    if B8 <= tile_b:
        if B8 >= 1024:                       # big enough: split across 2 TCs
            return _round_up(_cdiv(B8, 2), 8)
        return B8                            # single tile
    n = _cdiv(B8, tile_b)
    if n > 1 and n % 2 == 1:
        n += 1                               # even tile count -> balanced split
    return max(8, _round_up(_cdiv(B8, n), 8))


def _vmem_limit_bytes(tb, x_itemsize):
    # double-buffered streamed input + output, plus resident weights & margin
    in_bytes = 2 * tb * IN_DIM * x_itemsize
    out_bytes = 2 * tb * OUT_PAD * 4
    resident = 2 * (IN_DIM * HID * 2 + 2 * HID * HID * 2 + HID * OUT_PAD * 2
                    + 8 * OUT_PAD * 4)
    total = in_bytes + out_bytes + resident + (6 << 20)
    return int(min(max(total, 16 << 20), 56 << 20))   # stay under v7x 64 MiB


def mlp_kernel(x_ref, w1_ref, b1_ref, w2_ref, b2_ref, w3_ref, b3_ref,
               w4_ref, b4_ref, o_ref):
    # Cast the streamed x tile to bf16 in-kernel (no wrapper materialization).
    x = x_ref[...].astype(jnp.bfloat16)

    # fc1 + ReLU (bf16 x bf16 -> f32 accumulation on the MXU)
    h = jnp.dot(x, w1_ref[...], preferred_element_type=jnp.float32) + b1_ref[...]
    h = jnp.maximum(h, 0.0)

    # fc2 + ReLU
    h = jnp.dot(h.astype(jnp.bfloat16), w2_ref[...],
                preferred_element_type=jnp.float32) + b2_ref[...]
    h = jnp.maximum(h, 0.0)

    # fc3 + ReLU
    h = jnp.dot(h.astype(jnp.bfloat16), w3_ref[...],
                preferred_element_type=jnp.float32) + b3_ref[...]
    h = jnp.maximum(h, 0.0)

    # fc4 (logits padded to 128 lanes; padded lanes carry f32 bias = -1e30)
    logits = jnp.dot(h.astype(jnp.bfloat16), w4_ref[...],
                     preferred_element_type=jnp.float32) + b4_ref[...]

    # log_softmax over the last axis (padded lanes contribute exp(...) == 0)
    m = jnp.max(logits, axis=-1, keepdims=True)
    shifted = logits - m
    lse = jnp.log(jnp.sum(jnp.exp(shifted), axis=-1, keepdims=True))
    o_ref[...] = shifted - lse


def net_forward(x, params, tile_b=DEFAULT_TILE_B):
    """x: (B, 784) f32 or bf16.  params: (in,out) f32 weights, (1,out) f32 biases."""
    B, D = x.shape
    assert D == IN_DIM

    tb = _pick_tile(B, tile_b)
    grid = (pl.cdiv(B, tb),)

    # Resident weights: w's in bf16 (MXU-friendly), biases in f32.  These are
    # tiny (<0.2 MiB total) and stay VMEM-resident via a constant index_map.
    w1 = params["w1"].astype(jnp.bfloat16)
    w2 = params["w2"].astype(jnp.bfloat16)
    w3 = params["w3"].astype(jnp.bfloat16)
    b1, b2, b3 = params["b1"], params["b2"], params["b3"]

    # Pad fc4 to a lane-dense 128-wide output (zero weight cols, -1e30 bias).
    w4p = (jnp.zeros((HID, OUT_PAD), jnp.float32)
           .at[:, :N_CLASSES].set(params["w4"])
           .astype(jnp.bfloat16))
    b4p = (jnp.full((1, OUT_PAD), -1e30, jnp.float32)
           .at[:, :N_CLASSES].set(params["b4"]))

    def resident(arr):
        # Constant block index -> DMA'd once, VMEM-resident across all tiles.
        return pl.BlockSpec(arr.shape, lambda i: (0, 0))

    out = pl.pallas_call(
        mlp_kernel,
        out_shape=jax.ShapeDtypeStruct((B, OUT_PAD), jnp.float32),
        grid=grid,
        in_specs=[
            pl.BlockSpec((tb, IN_DIM), lambda i: (i, 0)),   # streamed x tile
            resident(w1), resident(b1),
            resident(w2), resident(b2),
            resident(w3), resident(b3),
            resident(w4p), resident(b4p),
        ],
        out_specs=pl.BlockSpec((tb, OUT_PAD), lambda i: (i, 0)),
        compiler_params=pltpu.CompilerParams(
            dimension_semantics=("parallel",),
            vmem_limit_bytes=_vmem_limit_bytes(tb, x.dtype.itemsize)),
    )(x, w1, b1, w2, b2, w3, b3, w4p, b4p)

    return out[:, :N_CLASSES]


def init_params(key):
    """Deterministic init mimicking nn.Linear default (uniform +/- 1/sqrt(fan_in)).
    Weights stored as (in_features, out_features)."""
    dims = [(IN_DIM, HID), (HID, HID), (HID, HID), (HID, N_CLASSES)]
    params = {}
    for i, (fan_in, fan_out) in enumerate(dims, start=1):
        key, kw, kb = jax.random.split(key, 3)
        bound = 1.0 / np.sqrt(fan_in)
        params[f"w{i}"] = jax.random.uniform(
            kw, (fan_in, fan_out), jnp.float32, -bound, bound)
        params[f"b{i}"] = jax.random.uniform(
            kb, (1, fan_out), jnp.float32, -bound, bound)
    return params


def reference_forward(x, params):
    # Matches the kernel's precision choices: bf16 matmul operands, f32 accum,
    # f32 bias add / ReLU / log_softmax.
    def dot_bf16(a, w):
        return jnp.dot(a.astype(jnp.bfloat16), w.astype(jnp.bfloat16),
                       preferred_element_type=jnp.float32)

    h = jnp.maximum(dot_bf16(x, params["w1"]) + params["b1"], 0.0)
    h = jnp.maximum(dot_bf16(h, params["w2"]) + params["b2"], 0.0)
    h = jnp.maximum(dot_bf16(h, params["w3"]) + params["b3"], 0.0)
    logits = dot_bf16(h, params["w4"]) + params["b4"]
    return jax.nn.log_softmax(logits, axis=1)


if __name__ == "__main__":
    key = jax.random.PRNGKey(0)
    kp, kx1, kx2, kx3 = jax.random.split(key, 4)
    params = init_params(kp)

    # Small default batch (single tile).
    B = 8
    x = jax.random.normal(kx1, (B, IN_DIM), jnp.float32)
    out = jax.block_until_ready(net_forward(x, params))
    ref = reference_forward(x, params)
    np.testing.assert_allclose(np.asarray(out), np.asarray(ref),
                               rtol=2e-3, atol=2e-3)
    assert out.shape == (B, N_CLASSES)

    # Multi-tile grid with a partial last block (no input padding).
    B2 = 20
    x2 = jax.random.normal(kx2, (B2, IN_DIM), jnp.float32)
    out2 = jax.block_until_ready(net_forward(x2, params, tile_b=8))
    ref2 = reference_forward(x2, params)
    np.testing.assert_allclose(np.asarray(out2), np.asarray(ref2),
                               rtol=2e-3, atol=2e-3)
    assert out2.shape == (B2, N_CLASSES)

    # Non-multiple-of-8 batch within a single tile (partial block path),
    # fed as bf16 to exercise the zero-copy caller-supplied-bf16 path.
    B3 = 13
    x3 = jax.random.normal(kx3, (B3, IN_DIM), jnp.float32)
    out3 = jax.block_until_ready(net_forward(x3.astype(jnp.bfloat16), params))
    ref3 = reference_forward(x3, params)
    np.testing.assert_allclose(np.asarray(out3), np.asarray(ref3),
                               rtol=2e-3, atol=2e-3)
    assert out3.shape == (B3, N_CLASSES)

    print("KERNEL_OK")
</pallas_src>

<mosaic_0001>
module attributes {stable_mosaic.version = 11 : i64} {
  func.func @mlp_kernel(%arg0: i32, %arg1: memref<8x784xf32, #tpu.memory_space<vmem>>, %arg2: memref<784x64xbf16, #tpu.memory_space<vmem>>, %arg3: memref<1x64xf32, #tpu.memory_space<vmem>>, %arg4: memref<64x64xbf16, #tpu.memory_space<vmem>>, %arg5: memref<1x64xf32, #tpu.memory_space<vmem>>, %arg6: memref<64x64xbf16, #tpu.memory_space<vmem>>, %arg7: memref<1x64xf32, #tpu.memory_space<vmem>>, %arg8: memref<64x128xbf16, #tpu.memory_space<vmem>>, %arg9: memref<1x128xf32, #tpu.memory_space<vmem>>, %arg10: memref<8x128xf32, #tpu.memory_space<vmem>>) attributes {dimension_semantics = [#tpu.dimension_semantics<parallel>], iteration_bounds = array<i64: 1>, scalar_prefetch = 0 : i64, scratch_operands = 0 : i64, tpu.core_type = #tpu.core_type<tc>, window_params = [{transform_indices = @transform_0, window_bounds = array<i64: 8, 784>}, {pipeline_mode = #tpu.pipeline_mode<synchronous>, transform_indices = @transform_1, window_bounds = array<i64: 784, 64>}, {pipeline_mode = #tpu.pipeline_mode<synchronous>, transform_indices = @transform_2, window_bounds = array<i64: 1, 64>}, {pipeline_mode = #tpu.pipeline_mode<synchronous>, transform_indices = @transform_3, window_bounds = array<i64: 64, 64>}, {pipeline_mode = #tpu.pipeline_mode<synchronous>, transform_indices = @transform_4, window_bounds = array<i64: 1, 64>}, {pipeline_mode = #tpu.pipeline_mode<synchronous>, transform_indices = @transform_5, window_bounds = array<i64: 64, 64>}, {pipeline_mode = #tpu.pipeline_mode<synchronous>, transform_indices = @transform_6, window_bounds = array<i64: 1, 64>}, {pipeline_mode = #tpu.pipeline_mode<synchronous>, transform_indices = @transform_7, window_bounds = array<i64: 64, 128>}, {pipeline_mode = #tpu.pipeline_mode<synchronous>, transform_indices = @transform_8, window_bounds = array<i64: 1, 128>}, {transform_indices = @transform_9, window_bounds = array<i64: 8, 128>}]} {
    %c0 = arith.constant 0 : index
    %c0_0 = arith.constant 0 : index
    %0 = vector.load %arg1[%c0, %c0_0] : memref<8x784xf32, #tpu.memory_space<vmem>>, vector<8x784xf32>
    %1 = arith.truncf %0 : vector<8x784xf32> to vector<8x784xbf16>
    %c0_1 = arith.constant 0 : index
    %c0_2 = arith.constant 0 : index
    %2 = vector.load %arg2[%c0_1, %c0_2] : memref<784x64xbf16, #tpu.memory_space<vmem>>, vector<784x64xbf16>
    %cst = arith.constant dense<0.000000e+00> : vector<8x64xf32>
    %3 = tpu.matmul %1, %2, %cst {dimension_numbers = #tpu.dot_dimension_numbers<[1], [0], [0], [1], [0, 0, 1, 1], [], []>} : vector<8x784xbf16>, vector<784x64xbf16>, vector<8x64xf32> -> vector<8x64xf32>
    %c0_3 = arith.constant 0 : index
    %c0_4 = arith.constant 0 : index
    %4 = vector.load %arg3[%c0_3, %c0_4] : memref<1x64xf32, #tpu.memory_space<vmem>>, vector<1x64xf32>
    %5 = vector.broadcast %4 : vector<1x64xf32> to vector<8x64xf32>
    %6 = arith.addf %3, %5 : vector<8x64xf32>
    %cst_5 = arith.constant 0.000000e+00 : f32
    %7 = vector.broadcast %cst_5 : f32 to vector<8x64xf32>
    %8 = arith.maximumf %6, %7 : vector<8x64xf32>
    %9 = arith.truncf %8 : vector<8x64xf32> to vector<8x64xbf16>
    %c0_6 = arith.constant 0 : index
    %c0_7 = arith.constant 0 : index
    %10 = vector.load %arg4[%c0_6, %c0_7] : memref<64x64xbf16, #tpu.memory_space<vmem>>, vector<64x64xbf16>
    %cst_8 = arith.constant dense<0.000000e+00> : vector<8x64xf32>
    %11 = tpu.matmul %9, %10, %cst_8 {dimension_numbers = #tpu.dot_dimension_numbers<[1], [0], [0], [1], [0, 0, 1, 1], [], []>} : vector<8x64xbf16>, vector<64x64xbf16>, vector<8x64xf32> -> vector<8x64xf32>
    %c0_9 = arith.constant 0 : index
    %c0_10 = arith.constant 0 : index
    %12 = vector.load %arg5[%c0_9, %c0_10] : memref<1x64xf32, #tpu.memory_space<vmem>>, vector<1x64xf32>
    %13 = vector.broadcast %12 : vector<1x64xf32> to vector<8x64xf32>
    %14 = arith.addf %11, %13 : vector<8x64xf32>
    %cst_11 = arith.constant 0.000000e+00 : f32
    %15 = vector.broadcast %cst_11 : f32 to vector<8x64xf32>
    %16 = arith.maximumf %14, %15 : vector<8x64xf32>
    %17 = arith.truncf %16 : vector<8x64xf32> to vector<8x64xbf16>
    %c0_12 = arith.constant 0 : index
    %c0_13 = arith.constant 0 : index
    %18 = vector.load %arg6[%c0_12, %c0_13] : memref<64x64xbf16, #tpu.memory_space<vmem>>, vector<64x64xbf16>
    %cst_14 = arith.constant dense<0.000000e+00> : vector<8x64xf32>
    %19 = tpu.matmul %17, %18, %cst_14 {dimension_numbers = #tpu.dot_dimension_numbers<[1], [0], [0], [1], [0, 0, 1, 1], [], []>} : vector<8x64xbf16>, vector<64x64xbf16>, vector<8x64xf32> -> vector<8x64xf32>
    %c0_15 = arith.constant 0 : index
    %c0_16 = arith.constant 0 : index
    %20 = vector.load %arg7[%c0_15, %c0_16] : memref<1x64xf32, #tpu.memory_space<vmem>>, vector<1x64xf32>
    %21 = vector.broadcast %20 : vector<1x64xf32> to vector<8x64xf32>
    %22 = arith.addf %19, %21 : vector<8x64xf32>
    %cst_17 = arith.constant 0.000000e+00 : f32
    %23 = vector.broadcast %cst_17 : f32 to vector<8x64xf32>
    %24 = arith.maximumf %22, %23 : vector<8x64xf32>
    %25 = arith.truncf %24 : vector<8x64xf32> to vector<8x64xbf16>
    %c0_18 = arith.constant 0 : index
    %c0_19 = arith.constant 0 : index
    %26 = vector.load %arg8[%c0_18, %c0_19] : memref<64x128xbf16, #tpu.memory_space<vmem>>, vector<64x128xbf16>
    %cst_20 = arith.constant dense<0.000000e+00> : vector<8x128xf32>
    %27 = tpu.matmul %25, %26, %cst_20 {dimension_numbers = #tpu.dot_dimension_numbers<[1], [0], [0], [1], [0, 0, 1, 1], [], []>} : vector<8x64xbf16>, vector<64x128xbf16>, vector<8x128xf32> -> vector<8x128xf32>
    %c0_21 = arith.constant 0 : index
    %c0_22 = arith.constant 0 : index
    %28 = vector.load %arg9[%c0_21, %c0_22] : memref<1x128xf32, #tpu.memory_space<vmem>>, vector<1x128xf32>
    %29 = vector.broadcast %28 : vector<1x128xf32> to vector<8x128xf32>
    %30 = arith.addf %27, %29 : vector<8x128xf32>
    %cst_23 = arith.constant dense<0xFF800000> : vector<8xf32>
    %31 = vector.multi_reduction <maximumf>, %30, %cst_23 [1] : vector<8x128xf32> to vector<8xf32>
    %32 = vector.shape_cast %31 : vector<8xf32> to vector<8x1xf32>
    %33 = vector.broadcast %32 : vector<8x1xf32> to vector<8x128xf32>
    %34 = arith.subf %30, %33 : vector<8x128xf32>
    %35 = math.exp %34 : vector<8x128xf32>
    %cst_24 = arith.constant dense<0.000000e+00> : vector<8xf32>
    %36 = vector.multi_reduction <add>, %35, %cst_24 [1] : vector<8x128xf32> to vector<8xf32>
    %37 = vector.shape_cast %36 : vector<8xf32> to vector<8x1xf32>
    %38 = math.log %37 : vector<8x1xf32>
    %39 = vector.broadcast %38 : vector<8x1xf32> to vector<8x128xf32>
    %40 = arith.subf %34, %39 : vector<8x128xf32>
    %c0_25 = arith.constant 0 : index
    %c0_26 = arith.constant 0 : index
    %41 = vector.load %arg10[%c0_25, %c0_26] : memref<8x128xf32, #tpu.memory_space<vmem>>, vector<8x128xf32>
    tpu.vector_store %arg10[%c0_25, %c0_26], %40 {strides = array<i32>} : memref<8x128xf32, #tpu.memory_space<vmem>>, vector<8x128xf32>,
    return
  }
  func.func @transform_0(%arg0: i32) -> (i32, i32) {
    %c0_i32 = arith.constant 0 : i32
    %c0_i32_0 = arith.constant 0 : i32
    return %arg0, %c0_i32 : i32, i32
  }
  func.func @transform_1(%arg0: i32) -> (i32, i32) {
    %c0_i32 = arith.constant 0 : i32
    %c0_i32_0 = arith.constant 0 : i32
    %c0_i32_1 = arith.constant 0 : i32
    return %c0_i32, %c0_i32_0 : i32, i32
  }
  func.func @transform_2(%arg0: i32) -> (i32, i32) {
    %c0_i32 = arith.constant 0 : i32
    %c0_i32_0 = arith.constant 0 : i32
    %c0_i32_1 = arith.constant 0 : i32
    return %c0_i32, %c0_i32_0 : i32, i32
  }
  func.func @transform_3(%arg0: i32) -> (i32, i32) {
    %c0_i32 = arith.constant 0 : i32
    %c0_i32_0 = arith.constant 0 : i32
    %c0_i32_1 = arith.constant 0 : i32
    return %c0_i32, %c0_i32_0 : i32, i32
  }
  func.func @transform_4(%arg0: i32) -> (i32, i32) {
    %c0_i32 = arith.constant 0 : i32
    %c0_i32_0 = arith.constant 0 : i32
    %c0_i32_1 = arith.constant 0 : i32
    return %c0_i32, %c0_i32_0 : i32, i32
  }
  func.func @transform_5(%arg0: i32) -> (i32, i32) {
    %c0_i32 = arith.constant 0 : i32
    %c0_i32_0 = arith.constant 0 : i32
    %c0_i32_1 = arith.constant 0 : i32
    return %c0_i32, %c0_i32_0 : i32, i32
  }
  func.func @transform_6(%arg0: i32) -> (i32, i32) {
    %c0_i32 = arith.constant 0 : i32
    %c0_i32_0 = arith.constant 0 : i32
    %c0_i32_1 = arith.constant 0 : i32
    return %c0_i32, %c0_i32_0 : i32, i32
  }
  func.func @transform_7(%arg0: i32) -> (i32, i32) {
    %c0_i32 = arith.constant 0 : i32
    %c0_i32_0 = arith.constant 0 : i32
    %c0_i32_1 = arith.constant 0 : i32
    return %c0_i32, %c0_i32_0 : i32, i32
  }
  func.func @transform_8(%arg0: i32) -> (i32, i32) {
    %c0_i32 = arith.constant 0 : i32
    %c0_i32_0 = arith.constant 0 : i32
    %c0_i32_1 = arith.constant 0 : i32
    return %c0_i32, %c0_i32_0 : i32, i32
  }
  func.func @transform_9(%arg0: i32) -> (i32, i32) {
    %c0_i32 = arith.constant 0 : i32
    %c0_i32_0 = arith.constant 0 : i32
    return %arg0, %c0_i32 : i32, i32
  }
}

</mosaic_0001>

<bundles_post_ra>
// kernel: tpu_custom_call.1
= control target key start
LH: loop header
LB: loop body
LE: loop exit
PB: predicated region body
PF: predicated region fallthrough
CT: control target
= control target key end

     0   :  { %v1173_v44 = vmov 0.0   ;;  %vm1174_vm0 = vmmov 0   ;;  %vm447_vm1 = vcmask 130048   ;;  %s1469_s0 = inlined_call_operand.vmem [shape: f32[8,784], index: 0, kind: input, shape index: {}]   ;;  %s1470_s1 = inlined_call_operand.vmem [shape: bf16[784,64], index: 1, kind: input, shape index: {}]   ;;  %s1471_s2 = inlined_call_operand.vmem [shape: f32[1,64], index: 2, kind: input, shape index: {}]   ;;  %s1472_s3 = inlined_call_operand.vmem [shape: bf16[64,64], index: 3, kind: input, shape index: {}]   ;;  %s1473_s4 = inlined_call_operand.vmem [shape: f32[1,64], index: 4, kind: input, shape index: {}]   ;;  %s1474_s5 = inlined_call_operand.vmem [shape: bf16[64,64], index: 5, kind: input, shape index: {}]   ;;  %s1475_s6 = inlined_call_operand.vmem [shape: f32[1,64], index: 6, kind: input, shape index: {}]   ;;  %s1476_s7 = inlined_call_operand.vmem [shape: bf16[64,128], index: 7, kind: input, shape index: {}]   ;;  %s1477_s8 = inlined_call_operand.vmem [shape: f32[1,128], index: 8, kind: input, shape index: {}]   ;;  %s1478_s9 = inlined_call_operand.hbm [shape: f32[8,128], index: 9, kind: output, shape index: {}]  }
   0x1   :  { %v1086_v0 = vld [vmem:[%s1470_s1 + $0x78] sm:$0xff]   ;;  %v1090_v4 = vld [vmem:[%s1470_s1 + $0x70] sm:$0xff]   ;;  %v1094_v8 = vld [vmem:[%s1470_s1 + $0x68] sm:$0xff]  }
   0x2   :  { %v1087_v1 = vld [vmem:[%s1470_s1 + $0x38] sm:$0xff]   ;;  %958 = vmatprep.subr.bf16.mxu0 %v1086_v0  ;;  %v1091_v5 = vld [vmem:[%s1470_s1 + $0x30] sm:$0xff]   ;;  %v1095_v9 = vld [vmem:[%s1470_s1 + $0x28] sm:$0xff]  }
   0x3   :  { %v1088_v2 = vld [vmem:[%s1470_s1 + $0xf8] sm:$0xff]   ;;  %959 = vmatpush3.bf16.msra.mxu0 %v1087_v1  ;;  %v1092_v6 = vld [vmem:[%s1470_s1 + $0xf0] sm:$0xff]   ;;  %v1096_v10 = vld [vmem:[%s1470_s1 + $0xe8] sm:$0xff]  }
   0x4   :  { %v1089_v3 = vld [vmem:[%s1470_s1 + $0xb8] sm:$0xff]   ;;  %980 = vmatprep.subr.bf16.mxu1 %v1088_v2  ;;  %960 = vmatprep.subr.bf16.mxu0 %v1090_v4  ;;  %v1093_v7 = vld [vmem:[%s1470_s1 + $0xb0] sm:$0xff]   ;;  %v1097_v11 = vld [vmem:[%s1470_s1 + $0xa8] sm:$0xff]  }
   0x5   :  { %981 = vmatpush3.bf16.msra.mxu1 %v1089_v3  ;;  %v1098_v12 = vld [vmem:[%s1470_s1 + $0x60] sm:$0xff]   ;;  %v1102_v16 = vld [vmem:[%s1470_s1 + $0x58] sm:$0xff]   ;;  %v1106_v20 = vld [vmem:[%s1470_s1 + $0x50] sm:$0xff]  }
   0x6   :  { %982 = vmatprep.subr.bf16.mxu1 %v1092_v6  ;;  %v1099_v13 = vld [vmem:[%s1470_s1 + $0x20] sm:$0xff]   ;;  %v1103_v17 = vld [vmem:[%s1470_s1 + $0x18] sm:$0xff]   ;;  %v1107_v21 = vld [vmem:[%s1470_s1 + $0x10] sm:$0xff]  }
   0x7   :  { %961 = vmatpush3.bf16.msra.mxu0 %v1091_v5  ;;  %v1100_v14 = vld [vmem:[%s1470_s1 + $0xe0] sm:$0xff]   ;;  %v1104_v18 = vld [vmem:[%s1470_s1 + $0xd8] sm:$0xff]   ;;  %v1108_v22 = vld [vmem:[%s1470_s1 + $0xd0] sm:$0xff]  }
   0x8   :  { %962 = vmatprep.subr.bf16.mxu0 %v1094_v8  ;;  %v1101_v15 = vld [vmem:[%s1470_s1 + $0xa0] sm:$0xff]   ;;  %v1105_v19 = vld [vmem:[%s1470_s1 + $0x98] sm:$0xff]   ;;  %v1109_v23 = vld [vmem:[%s1470_s1 + $0x90] sm:$0xff]  }
   0x9   :  { %983 = vmatpush3.bf16.msra.mxu1 %v1093_v7  ;;  %v1110_v24 = vld [vmem:[%s1470_s1 + $0x48] sm:$0xff]   ;;  %v1114_v28 = vld [vmem:[%s1470_s1 + $0x40] sm:$0xff]   ;;  %v1118_v36 = vld [vmem:[%s1470_s1 + $0x178] sm:$0xff]  }
   0xa   :  { %984 = vmatprep.subr.bf16.mxu1 %v1096_v10  ;;  %v1111_v25 = vld [vmem:[%s1470_s1 + $0x8] sm:$0xff]   ;;  %v1115_v29 = vld [vmem:[%s1470_s1] sm:$0xff]   ;;  %v37_v37 = vld [vmem:[%s1469_s0 + $0x18] sm:$0xff] }
   0xb   :  { %963 = vmatpush3.bf16.msra.mxu0 %v1095_v9  ;;  %v1112_v26 = vld [vmem:[%s1470_s1 + $0xc8] sm:$0xff]   ;;  %v1116_v30 = vld [vmem:[%s1470_s1 + $0xc0] sm:$0xff]   ;;  %v44_v38 = vpack.c.bf16 %v37_v37, %v37_v37  ;;  %v1119_v39 = vld [vmem:[%s1470_s1 + $0x138] sm:$0xff]  }
   0xc   :  { %964 = vmatprep.subr.bf16.mxu0 %v1098_v12  ;;  %v1113_v27 = vld [vmem:[%s1470_s1 + $0x88] sm:$0xff]   ;;  %v1117_v33 = vld [vmem:[%s1470_s1 + $0x80] sm:$0xff]   ;;  %v36_v40 = vld [vmem:[%s1469_s0 + $0x10] sm:$0xff] }
   0xd   :  { %985 = vmatpush3.bf16.msra.mxu1 %v1097_v11  ;;  %v35_v31 = vld [vmem:[%s1469_s0 + $0x8] sm:$0xff]  ;;  %v34_v34 = vld [vmem:[%s1469_s0] sm:$0xff]  ;;  %523 = vmatprep.mubr.bf16.mxu1 %v44_v38  ;;  %v43_v41 = vpack.c.bf16 %v36_v40, %v36_v40  ;;  %v1120_v42 = vld [vmem:[%s1470_s1 + $0x170] sm:$0xff]  }
   0xe   :  { %986 = vmatprep.subr.bf16.mxu1 %v1100_v14  ;;  %v42_v32 = vpack.c.bf16 %v35_v31, %v35_v31  ;;  %v41_v35 = vpack.c.bf16 %v34_v34, %v34_v34  ;;  %v1121_v43 = vld [vmem:[%s1470_s1 + $0x130] sm:$0xff]   ;;  %v1122_v45 = vld [vmem:[%s1470_s1 + $0x168] sm:$0xff]   ;;  %v1124_v47 = vld [vmem:[%s1470_s1 + $0x160] sm:$0xff]  }
   0xf   :  { %965 = vmatpush3.bf16.msra.mxu0 %v1099_v13  ;;  %v1123_v46 = vld [vmem:[%s1470_s1 + $0x128] sm:$0xff]   ;;  %v1125_v48 = vld [vmem:[%s1470_s1 + $0x120] sm:$0xff]   ;;  %v1126_v49 = vld [vmem:[%s1470_s1 + $0x158] sm:$0xff]  }
  0x10   :  { %966 = vmatprep.subr.bf16.mxu0 %v1102_v16  ;;  %483 = vmatprep.mubr.bf16.mxu0 %v42_v32  ;;  %v1127_v50 = vld [vmem:[%s1470_s1 + $0x118] sm:$0xff]   ;;  %v1128_v51 = vld [vmem:[%s1470_s1 + $0x150] sm:$0xff]   ;;  %v1134_v53 = vld [vmem:[%s1470_s1 + $0x180] sm:$0xff]  }
  0x11   :  { %987 = vmatpush3.bf16.msra.mxu1 %v1101_v15  ;;  %v1129_v52 = vld [vmem:[%s1470_s1 + $0x110] sm:$0xff]   ;;  %v39_v54 = vld [vmem:[%s1469_s0 + $0x28] sm:$0xff]  ;;  %v1132_v60 = vld [vmem:[%s1470_s1 + $0x140] sm:$0xff]  }
  0x12   :  { %988 = vmatprep.subr.bf16.mxu1 %v1104_v18  ;;  %v1130_v55 = vld [vmem:[%s1470_s1 + $0x148] sm:$0xff]   ;;  %v46_v56 = vpack.c.bf16 %v39_v54, %v39_v54  ;;  %v40_v57 = vld [vmem:[%s1469_s0 + $0x30] sm:$0xff] }
  0x13   :  { %967 = vmatpush3.bf16.msra.mxu0 %v1103_v17  ;;  %v47_v58 = vpack.c.bf16 %v40_v57, %v40_v57  ;;  %v1131_v59 = vld [vmem:[%s1470_s1 + $0x108] sm:$0xff]  }
  0x14   :  { %968 = vmatprep.subr.bf16.mxu0 %v1106_v20 }
  0x15   :  { %989 = vmatpush3.bf16.msra.mxu1 %v1105_v19 }
  0x16   :  { %990 = vmatprep.subr.bf16.mxu1 %v1108_v22 }
  0x17   :  { %969 = vmatpush3.bf16.msra.mxu0 %v1107_v21 }
  0x18   :  { %970 = vmatprep.subr.bf16.mxu0 %v1110_v24 }
  0x19   :  { %991 = vmatpush3.bf16.msra.mxu1 %v1109_v23 }
  0x1a   :  { %992 = vmatprep.subr.bf16.mxu1 %v1112_v26 }
  0x1b   :  { %971 = vmatpush3.bf16.msra.mxu0 %v1111_v25 }
  0x1c   :  { %972 = vmatprep.subr.bf16.mxu0 %v1114_v28 }
  0x1d   :  { %993 = vmatpush3.bf16.msra.mxu1 %v1113_v27 }
  0x1e   :  { %994 = vmatprep.subr.bf16.mxu1 %v1116_v30 }
  0x1f   :  { %973 = vmatpush3.bf16.msra.mxu0 %v1115_v29 }
  0x20   :  { %1002 = vmatprep.subr.bf16.mxu0 %v1118_v36 }
  0x21   :  { %995 = vmatpush3.bf16.msra.mxu1 %v1117_v33 }
  0x22   :  { %484 = vmatmul.mubr.bf16.vlgmr.msra.gmra.mxu0 %v41_v35  ;;  %1041 = vmatprep.subr.bf16.mxu1 %v1173_v44 }
  0x23   :  { %1003 = vmatpush3.bf16.msra.mxu0 %v1119_v39  ;;  %563 = vmatprep.mubr.bf16.mxu0 %v46_v56 }
  0x24   :  { %524 = vmatmul.mubr.bf16.vlgmr.msra.gmra.mxu1 %v43_v41  ;;  %1004 = vmatprep.subr.bf16.mxu0 %v1120_v42 }
  0x25   :  { %1043 = vmatprep.mubr.msk.bf16.mxu1 %vm1174_vm0, %v1173_v44  ;;  %1042 = vmatpush3.bf16.msra.mxu1 %v1134_v53 }
  0x26   :  { %1047 = vmatprep.subr.bf16.mxu1 %v1173_v44 }
  0x27   :  { %1005 = vmatpush3.bf16.msra.mxu0 %v1121_v43 }
  0x28   :  { %1006 = vmatprep.subr.bf16.mxu0 %v1122_v45 }
  0x2b   :  { %1007 = vmatpush3.bf16.msra.mxu0 %v1123_v46 }
  0x2c   :  { %1008 = vmatprep.subr.bf16.mxu0 %v1124_v47  ;;  %1044 = vmatmul.mubr.msk.bf16.vlgmr.msra.gmra.mxu1 %vm447_vm1, %v47_v58 }
  0x2d   :  { %1055 = vmatprep.mubr.msk.bf16.mxu1 %vm1174_vm0, %v1173_v44 }
  0x2f   :  { %1009 = vmatpush3.bf16.msra.mxu0 %v1125_v48 }
  0x30   :  { %1010 = vmatprep.subr.bf16.mxu0 %v1126_v49 }
  0x33   :  { %1011 = vmatpush3.bf16.msra.mxu0 %v1127_v50 }
  0x34   :  { %1012 = vmatprep.subr.bf16.mxu0 %v1128_v51 }
  0x37   :  { %1013 = vmatpush3.bf16.msra.mxu0 %v1129_v52 }
  0x38   :  { %1014 = vmatprep.subr.bf16.mxu0 %v1130_v55 }
  0x39   :  { %14 = vsyncpa [#allocation3], 0  ;;  %v1133_v61 = vld [vmem:[%s1470_s1 + $0x100] sm:$0xff]   ;;  %v1135_v0 = vld [vmem:[%s1472_s3 + $0x18] sm:$0xff]   ;;  %vm652_vm2 = vcmask 523264  }
  0x3a   :  { %v38_v62 = vld [vmem:[%s1469_s0 + $0x20] sm:$0xff]  ;;  %1048 = vmatpush3.bf16.msra.mxu1 %v1135_v0  ;;  %v1136_v1 = vld [vmem:[%s1472_s3 + $0x10] sm:$0xff]   ;;  %v1137_v2 = vld [vmem:[%s1472_s3 + $0x8] sm:$0xff]  }
  0x3b   :  { %1015 = vmatpush3.bf16.msra.mxu0 %v1131_v59  ;;  %v45_v63 = vpack.c.bf16 %v38_v62, %v38_v62  ;;  %1049 = vmatprep.subr.bf16.mxu1 %v1173_v44  ;;  %v1138_v3 = vld [vmem:[%s1472_s3] sm:$0xff]   ;;  %v1139_v29 = vld [vmem:[%s1474_s5 + $0x18] sm:$0xff]   ;;  %v1140_v31 = vld [vmem:[%s1474_s5 + $0x10] sm:$0xff]  }
  0x3c   :  { %1016 = vmatprep.subr.bf16.mxu0 %v1132_v60  ;;  %v889_v17 = vld [vmem:[%s1471_s2] ss:$0 sm:$0xff]  ;;  %v1141_v32 = vld [vmem:[%s1474_s5 + $0x8] sm:$0xff]   ;;  %v1143_v34 = vld [vmem:[%s1476_s7 + $0x18] sm:$0xff]  }
  0x3d   :  { %v1142_v33 = vld [vmem:[%s1474_s5] sm:$0xff]   ;;  %v1144_v35 = vld [vmem:[%s1476_s7 + $0x10] sm:$0xff]   ;;  %v1145_v45 = vld [vmem:[%s1476_s7 + $0x8] sm:$0xff]  }
  0x3e   :  { %1050 = vmatpush3.bf16.msra.mxu1 %v1136_v1  ;;  %v940_v36 = vld [vmem:[%s1473_s4] ss:$0 sm:$0xff] }
  0x3f   :  { %1017 = vmatpush3.bf16.msra.mxu0 %v1133_v61  ;;  %1051 = vmatprep.subr.bf16.mxu1 %v1173_v44  ;;  %v1146_v46 = vld [vmem:[%s1476_s7] sm:$0xff]  }
  0x40   :  { %1071 = vmatprep.subr.bf16.mxu0 %v1173_v44  ;;  %v946_v47 = vld [vmem:[%s1475_s6] ss:$0 sm:$0xff]  ;;  %s1175_s6 = smov [#allocation2]  }
  0x41   :  { %s881_s7 = sshll.u32 %s1175_s6, 4  ;;  %s882_s7 = int_to_ptr.vmem [resolvable:$true] %s881_s7 }
  0x42   :  { %564 = vmatmul.mubr.bf16.vlgmr.msra.gmra.mxu0 %v45_v63  ;;  %1052 = vmatpush3.bf16.msra.mxu1 %v1137_v2  ;;  %p1156_p1 = scmp.lt.s32.totalorder %s882_s7, %s882_s7 }
  0x43   :  { %1079 = vmatprep.mubr.msk.bf16.mxu0 %vm1174_vm0, %v1173_v44  ;;  %1053 = vmatprep.subr.bf16.mxu1 %v1173_v44 }
  0x44   :  { %1072 = vmatpush3.bf16.msra.mxu0 %v1143_v34 }
  0x45   :  { %1073 = vmatprep.subr.bf16.mxu0 %v1173_v44 }
  0x46   :  { %1054 = vmatpush3.bf16.msra.mxu1 %v1138_v3 }
  0x47   :  { %1059 = vmatprep.subr.bf16.mxu1 %v1173_v44 }
  0x48   :  { %1074 = vmatpush3.bf16.msra.mxu0 %v1144_v35 }
  0x49   :  { %1075 = vmatprep.subr.bf16.mxu0 %v1173_v44 }
  0x4c   :  { %1076 = vmatpush3.bf16.msra.mxu0 %v1145_v45 }
  0x4d   :  { %1077 = vmatprep.subr.bf16.mxu0 %v1173_v44 }
  0x50   :  { %1078 = vmatpush3.bf16.msra.mxu0 %v1146_v46 }
  0xe2   :  { %v974_v4 = vpop.f32.mrf.mxu0 }
  0xe4   :  { %v975_v5 = vpop.f32.mrf.mxu0  ;;  %v996_v6 = vpop.f32.mrf.mxu1 }
  0xe5   :  { %v976_v16 = vadd.f32 %v975_v5, %v974_v4 }
  0xe6   :  { %v977_v7 = vpop.f32.mrf.mxu0  ;;  %v997_v8 = vpop.f32.mrf.mxu1 }
  0xe7   :  { %v486_v18 = vadd.f32 %v976_v16, %v889_v17  ;;  %v998_v19 = vadd.f32 %v997_v8, %v996_v6 }
  0xe8   :  { %v978_v9 = vpop.f32.mrf.mxu0  ;;  %v999_v10 = vpop.f32.mrf.mxu1 }
  0xe9   :  { %v526_v22 = vadd.f32 %v998_v19, %v486_v18 }
  0xea   :  { %v1000_v11 = vpop.f32.mrf.mxu1 }
  0xec   :  { %v605_v12 = vpop.f32.mrf.mxu1 }
  0xee   :  { %v1045_v13 = vpop.f32.mrf.mxu1 }
  0xf0   :  { %v608_v14 = vpop.f32.mrf.mxu1 }
  0xf2   :  { %v1046_v15 = vpop.f32.mrf.mxu1 }
 0x102   :  { %v1018_v20 = vpop.f32.mrf.mxu0 }
 0x104   :  { %v1019_v21 = vpop.f32.mrf.mxu0 }
 0x105   :  { %v1020_v23 = vadd.f32 %v1019_v21, %v1018_v20 }
 0x106   :  { %v1021_v24 = vpop.f32.mrf.mxu0 }
 0x107   :  { %v566_v25 = vadd.f32 %v1020_v23, %v526_v22 }
 0x108   :  { %v1022_v26 = vpop.f32.mrf.mxu0 }
 0x109   :  { %v606_v27 = vadd.f32 %v605_v12, %v566_v25 }
 0x10b   :  { %v611_v28 = vmax.f32 %v606_v27, 0.0 }
 0x10d   :  { %v612_v30 = vpack.c.bf16 %v611_v28, %v611_v28 }
 0x10f   :  { %1056 = vmatmul.mubr.msk.bf16.vlgmr.msra.gmra.mxu1 %vm652_vm2, %v612_v30 }
 0x110   :  { %1060 = vmatpush3.bf16.msra.mxu1 %v1139_v29  ;;  %1067 = vmatprep.mubr.msk.bf16.mxu1 %vm1174_vm0, %v1173_v44 }
 0x111   :  { %1061 = vmatprep.subr.bf16.mxu1 %v1173_v44 }
 0x114   :  { %1062 = vmatpush3.bf16.msra.mxu1 %v1140_v31 }
 0x115   :  { %1063 = vmatprep.subr.bf16.mxu1 %v1173_v44 }
 0x118   :  { %1064 = vmatpush3.bf16.msra.mxu1 %v1141_v32 }
 0x119   :  { %1065 = vmatprep.subr.bf16.mxu1 %v1173_v44  ;;  %v952_v44 = vld [vmem:[%s1477_s8] ss:$0 sm:$0xff]  ;;  %s1151_s8 = scalar_lea.vmem %s882_s7, 128 }
 0x11a   :  { %p1152_p0 = scmp.ne.s32.totalorder %s882_s7, %s1151_s8  ;;  %p1157_p2 = scmp.lt.s32.totalorder %s1151_s8, %s1151_s8 }
 0x11c   :  { %1066 = vmatpush3.bf16.msra.mxu1 %v1142_v33  ;;  %p1158_p3 = por %p1157_p2, %p1156_p1 }
 0x11e   :  { %p1159_p4 = pnand %p1158_p3, %p1152_p0 }
 0x1cf   :  { %v690_v37 = vpop.f32.mrf.mxu1 }
 0x1d0   :  { %v691_v38 = vadd.f32 %v940_v36, %v690_v37 }
 0x1d1   :  { %v1057_v39 = vpop.f32.mrf.mxu1 }
 0x1d2   :  { %v696_v40 = vmax.f32 %v691_v38, 0.0 }
 0x1d3   :  { %v693_v41 = vpop.f32.mrf.mxu1 }
 0x1d4   :  { %v697_v42 = vpack.c.bf16 %v696_v40, %v696_v40 }
 0x1d5   :  { %v1058_v43 = vpop.f32.mrf.mxu1 }
 0x1d6   :  { %1068 = vmatmul.mubr.msk.bf16.vlgmr.msra.gmra.mxu1 %vm652_vm2, %v697_v42 }
 0x296   :  { %v774_v48 = vpop.f32.mrf.mxu1 }
 0x297   :  { %v775_v49 = vadd.f32 %v946_v47, %v774_v48 }
 0x298   :  { %v1069_v50 = vpop.f32.mrf.mxu1 }
 0x299   :  { %v780_v51 = vmax.f32 %v775_v49, 0.0 }
 0x29a   :  { %v777_v52 = vpop.f32.mrf.mxu1 }
 0x29b   :  { %v781_v53 = vpack.c.bf16 %v780_v51, %v780_v51 }
 0x29c   :  { %v1070_v54 = vpop.f32.mrf.mxu1 }
 0x29d   :  { %1080 = vmatmul.mubr.msk.bf16.vlgmr.msra.gmra.mxu0 %vm652_vm2, %v781_v53 }
 0x35d   :  { %v858_v55 = vpop.f32.mrf.mxu0 }
 0x35e   :  { %v859_v56 = vadd.f32 %v952_v44, %v858_v55 }
 0x35f   :  { %v1081_v57 = vpop.f32.mrf.mxu0 }
 0x360   :  { %864 = vmax.xlane.f32.xlu0 %v859_v56 }
 0x361   :  { %v861_v58 = vpop.f32.mrf.mxu0 }
 0x363   :  { %v1082_v59 = vpop.f32.mrf.mxu0 }
 0x3e9   :  { %v865_v60 = vpop.xlane.xlu0 %864 }
 0x3ea   :  { %v866_v61 = vsub.f32 %v859_v56, %v865_v60 }
 0x3ec   :  { %v867_v62 = vmul.f32 1.442695, %v866_v61 }
 0x3ee   :  { %1147 = vpow2.f32 %v867_v62 }
 0x3fb   :  { %v1148_v63 = vpop.eup %1147 }
 0x3fc   :  { %869 = vadd.xlane.f32.xlu0 %v1148_v63 }
 0x485   :  { %v870_v0 = vpop.xlane.xlu0 %869 }
 0x486   :  { %1149 = vlog2.f32 %v870_v0 }
 0x493   :  { %v1150_v1 = vpop.eup %1149 }
 0x494   :  { %v872_v2 = vmul.f32 0.6931472, %v1150_v1 }
 0x496   :  { %v873_v3 = vsub.f32 %v866_v61, %v872_v2 }
 0x498   :  { %874 = vst [vmem:[#allocation2] sm:$0xff] %v873_v3 }
 0x499   :  { %1162 = shalt.err (!%p1159_p4)
}
 0x49a   :  { %884 = dma.vmem_to_hbm [thread:$0]  %s882_s7, 128, %s1478_s9, [#allocation3]  }
 0x49b   :  { %1171 = dma.done.wait [#allocation3], 128  }
 0x49c   :  { %1172 = vsyncadd [#allocation3], 4294967168 }
 0x49d   :  { %888 = vsyncpa [#allocation3], 1 }

</bundles_post_ra>
